<compile_context>
chip_gen: v7x
topology: tpu7x:2x2x1
jax: 0.10.0
libtpu: 0.0.40
codegen_flags: <defaults>
</compile_context>

<pallas_src>
import functools

import jax
import jax.numpy as jnp
from jax.experimental import pallas as pl
from jax.experimental.pallas import tpu as pltpu

_HEADS = ("actor", "critic", "baseline")   # kernel head order
_LANE = 128
_SUBLANE = 8


def _round_up(x, m):
    return (x + m - 1) // m * m


# ----------------------------- kernel helpers --------------------------------

def _fast_reciprocal(d):
    """EUP approximate reciprocal + one Newton step (divide off the VALU,
    ~f32-accurate result)."""
    r = pl.reciprocal(d, approx=True)
    return r * (2.0 - d * r)


def _hidden_act(h, kind):
    if kind == "relu":
        return jnp.maximum(h, 0.0)
    if kind == "selu":
        alpha = 1.6732632423543772
        scale = 1.0507009873554805
        # exp(min(h,0)) keeps the (masked-out) positive branch from overflowing.
        neg = alpha * (jnp.exp(jnp.minimum(h, 0.0)) - 1.0)
        return scale * jnp.where(h > 0.0, h, neg)
    raise ValueError(f"unknown activation {kind}")


def _make_fused_kernel(n_heads, n_lin, hidden_act, final_acts, out_valids):
    """Fused 3-head MLP.

    Refs:
      x_ref : (block_b, P)             f32  activations
      w_ref : (n_heads*n_lin, P, P)    bf16 zero-padded weights (all heads)
      b_ref : (n_heads*n_lin, 1, P)    bf16 zero-padded biases
      o_ref : (n_heads, block_b, P)    f32  lane-dense output slab
    """
    def kernel(x_ref, w_ref, b_ref, o_ref):
        x = x_ref[...]                       # f32
        block_b, p = x.shape
        lane = jax.lax.broadcasted_iota(jnp.int32, (block_b, p), 1)

        for hd in range(n_heads):
            h = x
            for l in range(n_lin):
                idx = hd * n_lin + l
                # Feed the MXU in the (bf16) weight dtype, accumulate in f32;
                # bias-add and activation math stay f32.
                h = jnp.dot(h.astype(w_ref.dtype), w_ref[idx],
                            preferred_element_type=jnp.float32) + b_ref[idx]
                if l < n_lin - 1:
                    h = _hidden_act(h, hidden_act)

            valid = lane < out_valids[hd]
            if final_acts[hd] == "softmax":
                # Mask padded lanes so they contribute 0 probability.
                y = jnp.where(valid, h, -1e30)
                m = jnp.max(y, axis=-1, keepdims=True)
                e = jnp.exp(y - m)
                h = e * _fast_reciprocal(jnp.sum(e, axis=-1, keepdims=True))
            elif final_acts[hd] == "sigmoid":
                z = jnp.exp(-jnp.clip(h, -60.0, 60.0))
                h = jnp.where(valid, _fast_reciprocal(1.0 + z), 0.0)
            else:
                raise ValueError(final_acts[hd])
            o_ref[hd] = h.astype(o_ref.dtype)

    return kernel


# ------------------------------ fused forward ---------------------------------

@functools.partial(jax.jit, static_argnames=("n_lin", "label_dim", "hidden_act"))
def _fused_forward(w_packed, b_packed, x, *, n_lin, label_dim, hidden_act):
    batch, dim = x.shape
    hl, p, _ = w_packed.shape
    n_heads = hl // n_lin

    # Pad batch to a sublane multiple; lanes are already padded to P=128k.
    bp = _round_up(batch, _SUBLANE)
    block_b = min(bp, 512)                 # row tile; comfortably fits v7x 64 MiB VMEM
    bp = _round_up(bp, block_b)
    x_pad = jnp.zeros((bp, p), jnp.float32).at[:batch, :dim].set(
        x.astype(jnp.float32))

    out_valids = (dim, label_dim, label_dim)
    final_acts = ("sigmoid", "softmax", "softmax")
    kernel = _make_fused_kernel(n_heads, n_lin, hidden_act, final_acts, out_valids)

    flops = 2 * n_heads * n_lin * bp * p * p
    transcendentals = n_heads * bp * p * (n_lin if hidden_act == "selu" else 1)
    bytes_accessed = (x_pad.size * 4
                      + w_packed.size * w_packed.dtype.itemsize
                      + b_packed.size * b_packed.dtype.itemsize
                      + n_heads * bp * p * 4)

    out = pl.pallas_call(
        kernel,
        out_shape=jax.ShapeDtypeStruct((n_heads, bp, p), jnp.float32),
        grid_spec=pltpu.PrefetchScalarGridSpec(
            num_scalar_prefetch=0,
            grid=(bp // block_b,),
            in_specs=[
                pl.BlockSpec((block_b, p), lambda i: (i, 0)),      # x row tile
                pl.BlockSpec((hl, p, p), lambda i: (0, 0, 0)),     # weights (resident)
                pl.BlockSpec((hl, 1, p), lambda i: (0, 0, 0)),     # biases  (resident)
            ],
            out_specs=pl.BlockSpec((n_heads, block_b, p), lambda i: (0, i, 0)),
        ),
        compiler_params=pltpu.CompilerParams(
            dimension_semantics=("parallel",)),
        cost_estimate=pl.CostEstimate(flops=flops,
                                      transcendentals=transcendentals,
                                      bytes_accessed=bytes_accessed),
    )(x_pad, w_packed, b_packed)

    selector = out[0, :batch, :dim]
    predictor = out[1, :batch, :label_dim]
    baseline = out[2, :batch, :label_dim]
    return selector, predictor, baseline


def invase_forward_all(packed, x, activation="relu"):
    sel, pred, base = _fused_forward(
        packed["w"], packed["b"], x,
        n_lin=packed["n_lin"], label_dim=packed["label_dim"],
        hidden_act=activation)
    return {"selector": sel, "predictor": pred, "baseline": base}


def invase_forward(packed, x, fw_module="actor", activation="relu"):
    """Mirrors InvaseModel.forward(inp, fw_module)."""
    if fw_module not in ("selector", "predictor", "baseline"):
        raise NotImplementedError("This was not supposed to be used.")
    return invase_forward_all(packed, x, activation)[fw_module]


# --------------------------- parameter construction --------------------------

def _init_linear(key, fan_in, fan_out):
    # PyTorch nn.Linear default: U(-1/sqrt(fan_in), 1/sqrt(fan_in))
    kw, kb = jax.random.split(key)
    bound = 1.0 / (fan_in ** 0.5)
    w = jax.random.uniform(kw, (fan_in, fan_out), jnp.float32, -bound, bound)
    b = jax.random.uniform(kb, (1, fan_out), jnp.float32, -bound, bound)
    return w, b


def init_invase_params(key, dim, label_dim, actor_h_dim, critic_h_dim, n_layer):
    def make_mlp(key, in_dim, h_dim, out_dim):
        dims = [in_dim] + [h_dim] * (n_layer - 1) + [out_dim]
        ws, bs = [], []
        keys = jax.random.split(key, len(dims) - 1)
        for k, di, do in zip(keys, dims[:-1], dims[1:]):
            w, b = _init_linear(k, di, do)
            ws.append(w)
            bs.append(b)
        return {"w": ws, "b": bs}

    k_a, k_c, k_b = jax.random.split(key, 3)
    return {"actor": make_mlp(k_a, dim, actor_h_dim, dim),
            "critic": make_mlp(k_c, dim, critic_h_dim, label_dim),
            "baseline": make_mlp(k_b, dim, critic_h_dim, label_dim)}


def pack_invase_params(params, param_dtype=jnp.bfloat16):
    """Zero-pad every layer to (P, P) with P a multiple of 128 and pack all heads
    into a single weight blob and a single bias blob."""
    n_lin = len(params["actor"]["w"])
    max_dim = max(max(w.shape) for hd in _HEADS for w in params[hd]["w"])
    p = _round_up(max_dim, _LANE)
    hl = len(_HEADS) * n_lin
    w_packed = jnp.zeros((hl, p, p), param_dtype)
    b_packed = jnp.zeros((hl, 1, p), param_dtype)
    for hi, hd in enumerate(_HEADS):
        for l, (w, b) in enumerate(zip(params[hd]["w"], params[hd]["b"])):
            idx = hi * n_lin + l
            w_packed = w_packed.at[idx, :w.shape[0], :w.shape[1]].set(
                w.astype(param_dtype))
            b_packed = b_packed.at[idx, 0, :b.shape[1]].set(
                b.reshape(-1).astype(param_dtype))
    label_dim = int(params["critic"]["w"][-1].shape[1])
    return {"w": w_packed, "b": b_packed, "n_lin": n_lin, "label_dim": label_dim}


# ------------------------------ JAX references ---------------------------------

def _ref_forward_all(params, x, activation, param_dtype=None):
    """Pure-JAX reference. If param_dtype is given, mirrors the kernel's
    precision policy (params + matmul inputs rounded to param_dtype, f32 math
    elsewhere); otherwise full f32 (PyTorch semantics)."""
    def cast_p(a):
        return a.astype(param_dtype) if param_dtype is not None else a

    def run(head, final):
        h = x.astype(jnp.float32)
        ws = [cast_p(w) for w in params[head]["w"]]
        bs = [cast_p(b) for b in params[head]["b"]]
        for i, (w, b) in enumerate(zip(ws, bs)):
            lhs = h.astype(param_dtype) if param_dtype is not None else h
            h = jnp.dot(lhs, w, preferred_element_type=jnp.float32) \
                + b.astype(jnp.float32)
            if i < len(ws) - 1:
                h = jax.nn.relu(h) if activation == "relu" else jax.nn.selu(h)
        return jax.nn.sigmoid(h) if final == "sigmoid" else jax.nn.softmax(h, axis=1)

    return {"selector": run("actor", "sigmoid"),
            "predictor": run("critic", "softmax"),
            "baseline": run("baseline", "softmax")}


# ----------------------------------- main -------------------------------------

if __name__ == "__main__":
    batch, dim, label_dim = 8, 16, 4
    actor_h_dim, critic_h_dim, n_layer = 32, 32, 3
    activation = "relu"
    param_dtype = jnp.bfloat16   # halves weight DMA; bf16 is MXU-native on v6e/v7x

    key = jax.random.PRNGKey(0)
    k_params, k_x = jax.random.split(key)
    params = init_invase_params(k_params, dim, label_dim,
                                actor_h_dim, critic_h_dim, n_layer)
    packed = pack_invase_params(params, param_dtype)
    x = jax.random.normal(k_x, (batch, dim), jnp.float32)

    # One fused kernel launch computes all three heads.
    outs = jax.block_until_ready(invase_forward_all(packed, x, activation))

    assert outs["selector"].shape == (batch, dim)
    assert outs["predictor"].shape == (batch, label_dim)
    assert outs["baseline"].shape == (batch, label_dim)

    # Tight check vs a reference using the same bf16 precision policy.
    ref_bf16 = _ref_forward_all(params, x, activation, param_dtype)
    # Loose check vs the full-f32 (PyTorch-semantics) reference: only bf16 rounding.
    ref_f32 = _ref_forward_all(params, x, activation, None)

    for mod in ("selector", "predictor", "baseline"):
        assert jnp.allclose(outs[mod], ref_bf16[mod], atol=5e-4, rtol=5e-4), mod
        assert jnp.allclose(outs[mod], ref_f32[mod], atol=2e-2, rtol=2e-2), mod
        # Per-module dispatch path (mirrors InvaseModel.forward).
        single = jax.block_until_ready(invase_forward(packed, x, mod, activation))
        assert jnp.allclose(single, outs[mod]), mod

    print("KERNEL_OK")
</pallas_src>

<mosaic_0001>
module attributes {stable_mosaic.version = 11 : i64} {
  func.func @kernel(%arg0: i32, %arg1: memref<8x128xf32, #tpu.memory_space<vmem>>, %arg2: memref<9x128x128xbf16, #tpu.memory_space<vmem>>, %arg3: memref<9x1x128xbf16, #tpu.memory_space<vmem>>, %arg4: memref<3x8x128xf32, #tpu.memory_space<vmem>>) attributes {dimension_semantics = [#tpu.dimension_semantics<parallel>], iteration_bounds = array<i64: 1>, scalar_prefetch = 0 : i64, scratch_operands = 0 : i64, tpu.core_type = #tpu.core_type<tc>, window_params = [{transform_indices = @transform_0, window_bounds = array<i64: 8, 128>}, {pipeline_mode = #tpu.pipeline_mode<synchronous>, transform_indices = @transform_1, window_bounds = array<i64: 9, 128, 128>}, {pipeline_mode = #tpu.pipeline_mode<synchronous>, transform_indices = @transform_2, window_bounds = array<i64: 9, 1, 128>}, {transform_indices = @transform_3, window_bounds = array<i64: 3, 8, 128>}]} {
    %c0 = arith.constant 0 : index
    %c0_0 = arith.constant 0 : index
    %0 = vector.load %arg1[%c0, %c0_0] : memref<8x128xf32, #tpu.memory_space<vmem>>, vector<8x128xf32>
    %1 = tpu.iota {dimensions = array<i32: 1>} : vector<8x128xi32>
    %2 = arith.truncf %0 : vector<8x128xf32> to vector<8x128xbf16>
    %c0_1 = arith.constant 0 : index
    %c0_2 = arith.constant 0 : index
    %c0_3 = arith.constant 0 : index
    %3 = vector.load %arg2[%c0_1, %c0_2, %c0_3] : memref<9x128x128xbf16, #tpu.memory_space<vmem>>, vector<1x128x128xbf16>
    %4 = vector.shape_cast %3 : vector<1x128x128xbf16> to vector<128x128xbf16>
    %cst = arith.constant dense<0.000000e+00> : vector<8x128xf32>
    %5 = tpu.matmul %2, %4, %cst {dimension_numbers = #tpu.dot_dimension_numbers<[1], [0], [0], [1], [0, 0, 1, 1], [], []>} : vector<8x128xbf16>, vector<128x128xbf16>, vector<8x128xf32> -> vector<8x128xf32>
    %c0_4 = arith.constant 0 : index
    %c0_5 = arith.constant 0 : index
    %c0_6 = arith.constant 0 : index
    %6 = vector.load %arg3[%c0_4, %c0_5, %c0_6] : memref<9x1x128xbf16, #tpu.memory_space<vmem>>, vector<1x1x128xbf16>
    %7 = vector.shape_cast %6 : vector<1x1x128xbf16> to vector<1x128xbf16>
    %8 = arith.extf %7 : vector<1x128xbf16> to vector<1x128xf32>
    %9 = vector.broadcast %8 : vector<1x128xf32> to vector<8x128xf32>
    %10 = arith.addf %5, %9 : vector<8x128xf32>
    %cst_7 = arith.constant 0.000000e+00 : f32
    %11 = vector.broadcast %cst_7 : f32 to vector<8x128xf32>
    %12 = arith.maximumf %10, %11 : vector<8x128xf32>
    %13 = arith.truncf %12 : vector<8x128xf32> to vector<8x128xbf16>
    %c1 = arith.constant 1 : index
    %c0_8 = arith.constant 0 : index
    %c0_9 = arith.constant 0 : index
    %14 = vector.load %arg2[%c1, %c0_8, %c0_9] : memref<9x128x128xbf16, #tpu.memory_space<vmem>>, vector<1x128x128xbf16>
    %15 = vector.shape_cast %14 : vector<1x128x128xbf16> to vector<128x128xbf16>
    %cst_10 = arith.constant dense<0.000000e+00> : vector<8x128xf32>
    %16 = tpu.matmul %13, %15, %cst_10 {dimension_numbers = #tpu.dot_dimension_numbers<[1], [0], [0], [1], [0, 0, 1, 1], [], []>} : vector<8x128xbf16>, vector<128x128xbf16>, vector<8x128xf32> -> vector<8x128xf32>
    %c1_11 = arith.constant 1 : index
    %c0_12 = arith.constant 0 : index
    %c0_13 = arith.constant 0 : index
    %17 = vector.load %arg3[%c1_11, %c0_12, %c0_13] : memref<9x1x128xbf16, #tpu.memory_space<vmem>>, vector<1x1x128xbf16>
    %18 = vector.shape_cast %17 : vector<1x1x128xbf16> to vector<1x128xbf16>
    %19 = arith.extf %18 : vector<1x128xbf16> to vector<1x128xf32>
    %20 = vector.broadcast %19 : vector<1x128xf32> to vector<8x128xf32>
    %21 = arith.addf %16, %20 : vector<8x128xf32>
    %cst_14 = arith.constant 0.000000e+00 : f32
    %22 = vector.broadcast %cst_14 : f32 to vector<8x128xf32>
    %23 = arith.maximumf %21, %22 : vector<8x128xf32>
    %24 = arith.truncf %23 : vector<8x128xf32> to vector<8x128xbf16>
    %c2 = arith.constant 2 : index
    %c0_15 = arith.constant 0 : index
    %c0_16 = arith.constant 0 : index
    %25 = vector.load %arg2[%c2, %c0_15, %c0_16] : memref<9x128x128xbf16, #tpu.memory_space<vmem>>, vector<1x128x128xbf16>
    %26 = vector.shape_cast %25 : vector<1x128x128xbf16> to vector<128x128xbf16>
    %cst_17 = arith.constant dense<0.000000e+00> : vector<8x128xf32>
    %27 = tpu.matmul %24, %26, %cst_17 {dimension_numbers = #tpu.dot_dimension_numbers<[1], [0], [0], [1], [0, 0, 1, 1], [], []>} : vector<8x128xbf16>, vector<128x128xbf16>, vector<8x128xf32> -> vector<8x128xf32>
    %c2_18 = arith.constant 2 : index
    %c0_19 = arith.constant 0 : index
    %c0_20 = arith.constant 0 : index
    %28 = vector.load %arg3[%c2_18, %c0_19, %c0_20] : memref<9x1x128xbf16, #tpu.memory_space<vmem>>, vector<1x1x128xbf16>
    %29 = vector.shape_cast %28 : vector<1x1x128xbf16> to vector<1x128xbf16>
    %30 = arith.extf %29 : vector<1x128xbf16> to vector<1x128xf32>
    %31 = vector.broadcast %30 : vector<1x128xf32> to vector<8x128xf32>
    %32 = arith.addf %27, %31 : vector<8x128xf32>
    %c16_i32 = arith.constant 16 : i32
    %33 = vector.broadcast %c16_i32 : i32 to vector<8x128xi32>
    %34 = arith.cmpi slt, %1, %33 : vector<8x128xi32>
    %cst_21 = arith.constant -6.000000e+01 : f32
    %cst_22 = arith.constant 6.000000e+01 : f32
    %35 = vector.broadcast %cst_21 : f32 to vector<8x128xf32>
    %36 = arith.maximumf %35, %32 : vector<8x128xf32>
    %37 = vector.broadcast %cst_22 : f32 to vector<8x128xf32>
    %38 = arith.minimumf %37, %36 : vector<8x128xf32>
    %cst_23 = arith.constant 0.000000e+00 : f32
    %39 = vector.broadcast %cst_23 : f32 to vector<8x128xf32>
    %40 = arith.subf %39, %38 : vector<8x128xf32>
    %41 = math.exp %40 : vector<8x128xf32>
    %cst_24 = arith.constant 1.000000e+00 : f32
    %42 = vector.broadcast %cst_24 : f32 to vector<8x128xf32>
    %43 = arith.addf %42, %41 : vector<8x128xf32>
    %44 = tpu.reciprocal %43 {approx = true} : vector<8x128xf32> -> vector<8x128xf32>
    %45 = arith.mulf %43, %44 : vector<8x128xf32>
    %cst_25 = arith.constant 2.000000e+00 : f32
    %46 = vector.broadcast %cst_25 : f32 to vector<8x128xf32>
    %47 = arith.subf %46, %45 : vector<8x128xf32>
    %48 = arith.mulf %44, %47 : vector<8x128xf32>
    %cst_26 = arith.constant 0.000000e+00 : f32
    %49 = vector.broadcast %cst_26 : f32 to vector<8x128xf32>
    %50 = arith.select %34, %48, %49 : vector<8x128xi1>, vector<8x128xf32>
    %c0_27 = arith.constant 0 : index
    %c0_28 = arith.constant 0 : index
    %c0_29 = arith.constant 0 : index
    %51 = vector.load %arg4[%c0_27, %c0_28, %c0_29] : memref<3x8x128xf32, #tpu.memory_space<vmem>>, vector<1x8x128xf32>
    %52 = vector.shape_cast %51 : vector<1x8x128xf32> to vector<8x128xf32>
    %53 = vector.shape_cast %50 : vector<8x128xf32> to vector<1x8x128xf32>
    tpu.vector_store %arg4[%c0_27, %c0_28, %c0_29], %53 {strides = array<i32>} : memref<3x8x128xf32, #tpu.memory_space<vmem>>, vector<1x8x128xf32>,
    %54 = arith.truncf %0 : vector<8x128xf32> to vector<8x128xbf16>
    %c3 = arith.constant 3 : index
    %c0_30 = arith.constant 0 : index
    %c0_31 = arith.constant 0 : index
    %55 = vector.load %arg2[%c3, %c0_30, %c0_31] : memref<9x128x128xbf16, #tpu.memory_space<vmem>>, vector<1x128x128xbf16>
    %56 = vector.shape_cast %55 : vector<1x128x128xbf16> to vector<128x128xbf16>
    %cst_32 = arith.constant dense<0.000000e+00> : vector<8x128xf32>
    %57 = tpu.matmul %54, %56, %cst_32 {dimension_numbers = #tpu.dot_dimension_numbers<[1], [0], [0], [1], [0, 0, 1, 1], [], []>} : vector<8x128xbf16>, vector<128x128xbf16>, vector<8x128xf32> -> vector<8x128xf32>
    %c3_33 = arith.constant 3 : index
    %c0_34 = arith.constant 0 : index
    %c0_35 = arith.constant 0 : index
    %58 = vector.load %arg3[%c3_33, %c0_34, %c0_35] : memref<9x1x128xbf16, #tpu.memory_space<vmem>>, vector<1x1x128xbf16>
    %59 = vector.shape_cast %58 : vector<1x1x128xbf16> to vector<1x128xbf16>
    %60 = arith.extf %59 : vector<1x128xbf16> to vector<1x128xf32>
    %61 = vector.broadcast %60 : vector<1x128xf32> to vector<8x128xf32>
    %62 = arith.addf %57, %61 : vector<8x128xf32>
    %cst_36 = arith.constant 0.000000e+00 : f32
    %63 = vector.broadcast %cst_36 : f32 to vector<8x128xf32>
    %64 = arith.maximumf %62, %63 : vector<8x128xf32>
    %65 = arith.truncf %64 : vector<8x128xf32> to vector<8x128xbf16>
    %c4 = arith.constant 4 : index
    %c0_37 = arith.constant 0 : index
    %c0_38 = arith.constant 0 : index
    %66 = vector.load %arg2[%c4, %c0_37, %c0_38] : memref<9x128x128xbf16, #tpu.memory_space<vmem>>, vector<1x128x128xbf16>
    %67 = vector.shape_cast %66 : vector<1x128x128xbf16> to vector<128x128xbf16>
    %cst_39 = arith.constant dense<0.000000e+00> : vector<8x128xf32>
    %68 = tpu.matmul %65, %67, %cst_39 {dimension_numbers = #tpu.dot_dimension_numbers<[1], [0], [0], [1], [0, 0, 1, 1], [], []>} : vector<8x128xbf16>, vector<128x128xbf16>, vector<8x128xf32> -> vector<8x128xf32>
    %c4_40 = arith.constant 4 : index
    %c0_41 = arith.constant 0 : index
    %c0_42 = arith.constant 0 : index
    %69 = vector.load %arg3[%c4_40, %c0_41, %c0_42] : memref<9x1x128xbf16, #tpu.memory_space<vmem>>, vector<1x1x128xbf16>
    %70 = vector.shape_cast %69 : vector<1x1x128xbf16> to vector<1x128xbf16>
    %71 = arith.extf %70 : vector<1x128xbf16> to vector<1x128xf32>
    %72 = vector.broadcast %71 : vector<1x128xf32> to vector<8x128xf32>
    %73 = arith.addf %68, %72 : vector<8x128xf32>
    %cst_43 = arith.constant 0.000000e+00 : f32
    %74 = vector.broadcast %cst_43 : f32 to vector<8x128xf32>
    %75 = arith.maximumf %73, %74 : vector<8x128xf32>
    %76 = arith.truncf %75 : vector<8x128xf32> to vector<8x128xbf16>
    %c5 = arith.constant 5 : index
    %c0_44 = arith.constant 0 : index
    %c0_45 = arith.constant 0 : index
    %77 = vector.load %arg2[%c5, %c0_44, %c0_45] : memref<9x128x128xbf16, #tpu.memory_space<vmem>>, vector<1x128x128xbf16>
    %78 = vector.shape_cast %77 : vector<1x128x128xbf16> to vector<128x128xbf16>
    %cst_46 = arith.constant dense<0.000000e+00> : vector<8x128xf32>
    %79 = tpu.matmul %76, %78, %cst_46 {dimension_numbers = #tpu.dot_dimension_numbers<[1], [0], [0], [1], [0, 0, 1, 1], [], []>} : vector<8x128xbf16>, vector<128x128xbf16>, vector<8x128xf32> -> vector<8x128xf32>
    %c5_47 = arith.constant 5 : index
    %c0_48 = arith.constant 0 : index
    %c0_49 = arith.constant 0 : index
    %80 = vector.load %arg3[%c5_47, %c0_48, %c0_49] : memref<9x1x128xbf16, #tpu.memory_space<vmem>>, vector<1x1x128xbf16>
    %81 = vector.shape_cast %80 : vector<1x1x128xbf16> to vector<1x128xbf16>
    %82 = arith.extf %81 : vector<1x128xbf16> to vector<1x128xf32>
    %83 = vector.broadcast %82 : vector<1x128xf32> to vector<8x128xf32>
    %84 = arith.addf %79, %83 : vector<8x128xf32>
    %c4_i32 = arith.constant 4 : i32
    %85 = vector.broadcast %c4_i32 : i32 to vector<8x128xi32>
    %86 = arith.cmpi slt, %1, %85 : vector<8x128xi32>
    %cst_50 = arith.constant -1.000000e+30 : f32
    %87 = vector.broadcast %cst_50 : f32 to vector<8x128xf32>
    %88 = arith.select %86, %84, %87 : vector<8x128xi1>, vector<8x128xf32>
    %cst_51 = arith.constant dense<0xFF800000> : vector<8xf32>
    %89 = vector.multi_reduction <maximumf>, %88, %cst_51 [1] : vector<8x128xf32> to vector<8xf32>
    %90 = vector.shape_cast %89 : vector<8xf32> to vector<8x1xf32>
    %91 = vector.broadcast %90 : vector<8x1xf32> to vector<8x128xf32>
    %92 = arith.subf %88, %91 : vector<8x128xf32>
    %93 = math.exp %92 : vector<8x128xf32>
    %cst_52 = arith.constant dense<0.000000e+00> : vector<8xf32>
    %94 = vector.multi_reduction <add>, %93, %cst_52 [1] : vector<8x128xf32> to vector<8xf32>
    %95 = vector.shape_cast %94 : vector<8xf32> to vector<8x1xf32>
    %96 = tpu.reciprocal %95 {approx = true} : vector<8x1xf32> -> vector<8x1xf32>
    %97 = arith.mulf %95, %96 : vector<8x1xf32>
    %cst_53 = arith.constant 2.000000e+00 : f32
    %98 = vector.broadcast %cst_53 : f32 to vector<8x1xf32>
    %99 = arith.subf %98, %97 : vector<8x1xf32>
    %100 = arith.mulf %96, %99 : vector<8x1xf32>
    %101 = vector.broadcast %100 : vector<8x1xf32> to vector<8x128xf32>
    %102 = arith.mulf %93, %101 : vector<8x128xf32>
    %c1_54 = arith.constant 1 : index
    %c0_55 = arith.constant 0 : index
    %c0_56 = arith.constant 0 : index
    %103 = vector.load %arg4[%c1_54, %c0_55, %c0_56] : memref<3x8x128xf32, #tpu.memory_space<vmem>>, vector<1x8x128xf32>
    %104 = vector.shape_cast %103 : vector<1x8x128xf32> to vector<8x128xf32>
    %105 = vector.shape_cast %102 : vector<8x128xf32> to vector<1x8x128xf32>
    tpu.vector_store %arg4[%c1_54, %c0_55, %c0_56], %105 {strides = array<i32>} : memref<3x8x128xf32, #tpu.memory_space<vmem>>, vector<1x8x128xf32>,
    %106 = arith.truncf %0 : vector<8x128xf32> to vector<8x128xbf16>
    %c6 = arith.constant 6 : index
    %c0_57 = arith.constant 0 : index
    %c0_58 = arith.constant 0 : index
    %107 = vector.load %arg2[%c6, %c0_57, %c0_58] : memref<9x128x128xbf16, #tpu.memory_space<vmem>>, vector<1x128x128xbf16>
    %108 = vector.shape_cast %107 : vector<1x128x128xbf16> to vector<128x128xbf16>
    %cst_59 = arith.constant dense<0.000000e+00> : vector<8x128xf32>
    %109 = tpu.matmul %106, %108, %cst_59 {dimension_numbers = #tpu.dot_dimension_numbers<[1], [0], [0], [1], [0, 0, 1, 1], [], []>} : vector<8x128xbf16>, vector<128x128xbf16>, vector<8x128xf32> -> vector<8x128xf32>
    %c6_60 = arith.constant 6 : index
    %c0_61 = arith.constant 0 : index
    %c0_62 = arith.constant 0 : index
    %110 = vector.load %arg3[%c6_60, %c0_61, %c0_62] : memref<9x1x128xbf16, #tpu.memory_space<vmem>>, vector<1x1x128xbf16>
    %111 = vector.shape_cast %110 : vector<1x1x128xbf16> to vector<1x128xbf16>
    %112 = arith.extf %111 : vector<1x128xbf16> to vector<1x128xf32>
    %113 = vector.broadcast %112 : vector<1x128xf32> to vector<8x128xf32>
    %114 = arith.addf %109, %113 : vector<8x128xf32>
    %cst_63 = arith.constant 0.000000e+00 : f32
    %115 = vector.broadcast %cst_63 : f32 to vector<8x128xf32>
    %116 = arith.maximumf %114, %115 : vector<8x128xf32>
    %117 = arith.truncf %116 : vector<8x128xf32> to vector<8x128xbf16>
    %c7 = arith.constant 7 : index
    %c0_64 = arith.constant 0 : index
    %c0_65 = arith.constant 0 : index
    %118 = vector.load %arg2[%c7, %c0_64, %c0_65] : memref<9x128x128xbf16, #tpu.memory_space<vmem>>, vector<1x128x128xbf16>
    %119 = vector.shape_cast %118 : vector<1x128x128xbf16> to vector<128x128xbf16>
    %cst_66 = arith.constant dense<0.000000e+00> : vector<8x128xf32>
    %120 = tpu.matmul %117, %119, %cst_66 {dimension_numbers = #tpu.dot_dimension_numbers<[1], [0], [0], [1], [0, 0, 1, 1], [], []>} : vector<8x128xbf16>, vector<128x128xbf16>, vector<8x128xf32> -> vector<8x128xf32>
    %c7_67 = arith.constant 7 : index
    %c0_68 = arith.constant 0 : index
    %c0_69 = arith.constant 0 : index
    %121 = vector.load %arg3[%c7_67, %c0_68, %c0_69] : memref<9x1x128xbf16, #tpu.memory_space<vmem>>, vector<1x1x128xbf16>
    %122 = vector.shape_cast %121 : vector<1x1x128xbf16> to vector<1x128xbf16>
    %123 = arith.extf %122 : vector<1x128xbf16> to vector<1x128xf32>
    %124 = vector.broadcast %123 : vector<1x128xf32> to vector<8x128xf32>
    %125 = arith.addf %120, %124 : vector<8x128xf32>
    %cst_70 = arith.constant 0.000000e+00 : f32
    %126 = vector.broadcast %cst_70 : f32 to vector<8x128xf32>
    %127 = arith.maximumf %125, %126 : vector<8x128xf32>
    %128 = arith.truncf %127 : vector<8x128xf32> to vector<8x128xbf16>
    %c8 = arith.constant 8 : index
    %c0_71 = arith.constant 0 : index
    %c0_72 = arith.constant 0 : index
    %129 = vector.load %arg2[%c8, %c0_71, %c0_72] : memref<9x128x128xbf16, #tpu.memory_space<vmem>>, vector<1x128x128xbf16>
    %130 = vector.shape_cast %129 : vector<1x128x128xbf16> to vector<128x128xbf16>
    %cst_73 = arith.constant dense<0.000000e+00> : vector<8x128xf32>
    %131 = tpu.matmul %128, %130, %cst_73 {dimension_numbers = #tpu.dot_dimension_numbers<[1], [0], [0], [1], [0, 0, 1, 1], [], []>} : vector<8x128xbf16>, vector<128x128xbf16>, vector<8x128xf32> -> vector<8x128xf32>
    %c8_74 = arith.constant 8 : index
    %c0_75 = arith.constant 0 : index
    %c0_76 = arith.constant 0 : index
    %132 = vector.load %arg3[%c8_74, %c0_75, %c0_76] : memref<9x1x128xbf16, #tpu.memory_space<vmem>>, vector<1x1x128xbf16>
    %133 = vector.shape_cast %132 : vector<1x1x128xbf16> to vector<1x128xbf16>
    %134 = arith.extf %133 : vector<1x128xbf16> to vector<1x128xf32>
    %135 = vector.broadcast %134 : vector<1x128xf32> to vector<8x128xf32>
    %136 = arith.addf %131, %135 : vector<8x128xf32>
    %c4_i32_77 = arith.constant 4 : i32
    %137 = vector.broadcast %c4_i32_77 : i32 to vector<8x128xi32>
    %138 = arith.cmpi slt, %1, %137 : vector<8x128xi32>
    %cst_78 = arith.constant -1.000000e+30 : f32
    %139 = vector.broadcast %cst_78 : f32 to vector<8x128xf32>
    %140 = arith.select %138, %136, %139 : vector<8x128xi1>, vector<8x128xf32>
    %cst_79 = arith.constant dense<0xFF800000> : vector<8xf32>
    %141 = vector.multi_reduction <maximumf>, %140, %cst_79 [1] : vector<8x128xf32> to vector<8xf32>
    %142 = vector.shape_cast %141 : vector<8xf32> to vector<8x1xf32>
    %143 = vector.broadcast %142 : vector<8x1xf32> to vector<8x128xf32>
    %144 = arith.subf %140, %143 : vector<8x128xf32>
    %145 = math.exp %144 : vector<8x128xf32>
    %cst_80 = arith.constant dense<0.000000e+00> : vector<8xf32>
    %146 = vector.multi_reduction <add>, %145, %cst_80 [1] : vector<8x128xf32> to vector<8xf32>
    %147 = vector.shape_cast %146 : vector<8xf32> to vector<8x1xf32>
    %148 = tpu.reciprocal %147 {approx = true} : vector<8x1xf32> -> vector<8x1xf32>
    %149 = arith.mulf %147, %148 : vector<8x1xf32>
    %cst_81 = arith.constant 2.000000e+00 : f32
    %150 = vector.broadcast %cst_81 : f32 to vector<8x1xf32>
    %151 = arith.subf %150, %149 : vector<8x1xf32>
    %152 = arith.mulf %148, %151 : vector<8x1xf32>
    %153 = vector.broadcast %152 : vector<8x1xf32> to vector<8x128xf32>
    %154 = arith.mulf %145, %153 : vector<8x128xf32>
    %c2_82 = arith.constant 2 : index
    %c0_83 = arith.constant 0 : index
    %c0_84 = arith.constant 0 : index
    %155 = vector.load %arg4[%c2_82, %c0_83, %c0_84] : memref<3x8x128xf32, #tpu.memory_space<vmem>>, vector<1x8x128xf32>
    %156 = vector.shape_cast %155 : vector<1x8x128xf32> to vector<8x128xf32>
    %157 = vector.shape_cast %154 : vector<8x128xf32> to vector<1x8x128xf32>
    tpu.vector_store %arg4[%c2_82, %c0_83, %c0_84], %157 {strides = array<i32>} : memref<3x8x128xf32, #tpu.memory_space<vmem>>, vector<1x8x128xf32>,
    return
  }
  func.func @transform_0(%arg0: i32) -> (i32, i32) {
    %c0_i32 = arith.constant 0 : i32
    %c0_i32_0 = arith.constant 0 : i32
    return %arg0, %c0_i32 : i32, i32
  }
  func.func @transform_1(%arg0: i32) -> (i32, i32, i32) {
    %c0_i32 = arith.constant 0 : i32
    %c0_i32_0 = arith.constant 0 : i32
    %c0_i32_1 = arith.constant 0 : i32
    %c0_i32_2 = arith.constant 0 : i32
    return %c0_i32, %c0_i32_0, %c0_i32_1 : i32, i32, i32
  }
  func.func @transform_2(%arg0: i32) -> (i32, i32, i32) {
    %c0_i32 = arith.constant 0 : i32
    %c0_i32_0 = arith.constant 0 : i32
    %c0_i32_1 = arith.constant 0 : i32
    %c0_i32_2 = arith.constant 0 : i32
    return %c0_i32, %c0_i32_0, %c0_i32_1 : i32, i32, i32
  }
  func.func @transform_3(%arg0: i32) -> (i32, i32, i32) {
    %c0_i32 = arith.constant 0 : i32
    %c0_i32_0 = arith.constant 0 : i32
    %c0_i32_1 = arith.constant 0 : i32
    return %c0_i32, %arg0, %c0_i32_0 : i32, i32, i32
  }
}

</mosaic_0001>

<bundles_post_ra>
// kernel: _fused_forward.1
= control target key start
LH: loop header
LB: loop body
LE: loop exit
PB: predicated region body
PF: predicated region fallthrough
CT: control target
= control target key end

     0   :  { %8 = vsyncpa [#allocation3], 0  ;;  %s1557_s12 = smov [#allocation2]   ;;  %s1749_s0 = inlined_call_operand.vmem [shape: f32[8,128], index: 0, kind: input, shape index: {}]   ;;  %s1750_s1 = inlined_call_operand.hbm [shape: bf16[9,128,128], index: 1, kind: input, shape index: {}]   ;;  %s1751_s2 = inlined_call_operand.vmem [shape: bf16[9,1,128], index: 2, kind: input, shape index: {}]   ;;  %s1752_s3 = inlined_call_operand.vmem [shape: f32[3,8,128], index: 3, kind: output, shape index: {}]  }
   0x1   :  { %s16_s13 = sshll.u32 %s1557_s12, 4  ;;  %s1533_s16 = scalar_lea.hbm %s1750_s1, 9216  ;;  %s17_s13 = int_to_ptr.vmem [resolvable:$true] %s16_s13 }
   0x2   :  { %p1534_p0 = scmp.ne.s32.totalorder %s1750_s1, %s1533_s16  ;;  %p1537_p1 = scmp.lt.u32.totalorder %s1533_s16, %s1750_s1 }
   0x4   :  { %p1539_p2 = pnand %p1537_p1, %p1534_p0 }
   0x6   :  { %1542 = shalt.err (!%p1539_p2)
}
   0x7   :  { %s1543_s21 = scalar_lea.vmem %s17_s13, 9216  ;;  %p1548_p4 = scmp.lt.s32.totalorder %s17_s13, %s17_s13 }
   0x8   :  { %p1544_p3 = scmp.ne.s32.totalorder %s17_s13, %s1543_s21  ;;  %p1549_p5 = scmp.lt.s32.totalorder %s1543_s21, %s1543_s21 }
   0xa   :  { %p1550_p6 = por %p1549_p5, %p1548_p4 }
   0xc   :  { %p1551_p7 = pnand %p1550_p6, %p1544_p3 }
   0xe   :  { %1554 = shalt.err (!%p1551_p7)
}
   0xf   :  { %s1558_s22 = smov 64   ;;  %s1559_s23 = smov 4  }
  0x10   :  { %22 = dma.hbm_to_vmem [thread:$0]  %s1750_s1, 9216, %s17_s13, [#allocation3], %s1558_s22, %s1558_s22, %s1559_s23  }
  0x11   :  { %1555 = dma.done.wait [#allocation3], 9216  }
  0x12   :  { %1556 = vsyncadd [#allocation3], 4294958080  ;;  %v1560_v0 = vmov 0.0   ;;  %vm1561_vm0 = vmmov 0   ;;  %v1449_v1 = vld [vmem:[#allocation2] sm:$0xff]   ;;  %v1450_v2 = vld [vmem:[#allocation2 + $0x8] sm:$0xff]   ;;  %v30_v26 = vlaneseq }
  0x13   :  { %1264 = vmatprep.subr.bf16.mxu0 %v1560_v0  ;;  %1280 = vmatprep.mubr.msk.bf16.mxu0 %vm1561_vm0, %v1560_v0  ;;  %v1451_v3 = vld [vmem:[#allocation2 + $0x10] sm:$0xff]   ;;  %v1457_v4 = vld [vmem:[#allocation2 + $0x40] sm:$0xff]   ;;  %v1452_v5 = vld [vmem:[#allocation2 + $0x18] sm:$0xff]  }
  0x14   :  { %1284 = vmatprep.subr.bf16.mxu1 %v1560_v0  ;;  %1300 = vmatprep.mubr.msk.bf16.mxu1 %vm1561_vm0, %v1560_v0  ;;  %v1458_v6 = vld [vmem:[#allocation2 + $0x48] sm:$0xff]   ;;  %v1453_v7 = vld [vmem:[#allocation2 + $0x20] sm:$0xff]   ;;  %v1459_v8 = vld [vmem:[#allocation2 + $0x50] sm:$0xff]   ;;  %v52_v27 = vshrl.u32 %v30_v26, 7 }
  0x15   :  { %1265 = vmatpush3.bf16.msra.mxu0 %v1449_v1  ;;  %1285 = vmatpush3.bf16.msra.mxu1 %v1457_v4  ;;  %v1454_v9 = vld [vmem:[#allocation2 + $0x28] sm:$0xff]   ;;  %v1460_v10 = vld [vmem:[#allocation2 + $0x58] sm:$0xff]   ;;  %v1455_v11 = vld [vmem:[#allocation2 + $0x30] sm:$0xff]  }
  0x16   :  { %1266 = vmatprep.subr.bf16.mxu0 %v1560_v0  ;;  %1286 = vmatprep.subr.bf16.mxu1 %v1560_v0  ;;  %v1461_v12 = vld [vmem:[#allocation2 + $0x60] sm:$0xff]   ;;  %v1456_v13 = vld [vmem:[#allocation2 + $0x38] sm:$0xff]   ;;  %v1462_v15 = vld [vmem:[#allocation2 + $0x68] sm:$0xff]   ;;  %v1635_v30 = vsub.s32 0, %v52_v27 }
  0x17   :  { %v29_v14 = vld [vmem:[%s1749_s0] sm:$0xff]  ;;  %v1463_v17 = vld [vmem:[#allocation2 + $0x70] sm:$0xff]   ;;  %v1464_v18 = vld [vmem:[#allocation2 + $0x78] sm:$0xff]  }
  0x18   :  { %v1615_v16 = vpack.c.bf16 %v29_v14, %v29_v14  ;;  %v1473_v19 = vld [vmem:[#allocation2 + $0x80] sm:$0xff]   ;;  %v1474_v20 = vld [vmem:[#allocation2 + $0x88] sm:$0xff]   ;;  %v1475_v21 = vld [vmem:[#allocation2 + $0x90] sm:$0xff]  }
  0x19   :  { %1267 = vmatpush3.bf16.msra.mxu0 %v1450_v2  ;;  %1287 = vmatpush3.bf16.msra.mxu1 %v1458_v6  ;;  %v1476_v22 = vld [vmem:[#allocation2 + $0x98] sm:$0xff]   ;;  %v1477_v23 = vld [vmem:[#allocation2 + $0xa0] sm:$0xff]   ;;  %v1478_v24 = vld [vmem:[#allocation2 + $0xa8] sm:$0xff]  }
  0x1a   :  { %1268 = vmatprep.subr.bf16.mxu0 %v1560_v0  ;;  %1288 = vmatprep.subr.bf16.mxu1 %v1560_v0  ;;  %v1479_v25 = vld [vmem:[#allocation2 + $0xb0] sm:$0xff]   ;;  %v49_v28 = vld [vmem:[%s1751_s2] sm:$0x1]  ;;  %v1466_v40 = vld [vmem:[#allocation2 + $0xc8] sm:$0xff]  }
  0x1b   :  { %v50_v29 = vunpack.c.l.bf16 %v49_v28  ;;  %v1465_v38 = vld [vmem:[#allocation2 + $0xc0] sm:$0xff]   ;;  %v1467_v41 = vld [vmem:[#allocation2 + $0xd0] sm:$0xff]   ;;  %v1468_v42 = vld [vmem:[#allocation2 + $0xd8] sm:$0xff]  }
  0x1c   :  { %v1469_v43 = vld [vmem:[#allocation2 + $0xe0] sm:$0xff]   ;;  %v1470_v44 = vld [vmem:[#allocation2 + $0xe8] sm:$0xff]   ;;  %v1471_v45 = vld [vmem:[#allocation2 + $0xf0] sm:$0xff]  }
  0x1d   :  { %1269 = vmatpush3.bf16.msra.mxu0 %v1451_v3  ;;  %1289 = vmatpush3.bf16.msra.mxu1 %v1459_v8  ;;  %v54_v31 = vrot.slane %v50_v29, %v1635_v30  ;;  %v1472_v46 = vld [vmem:[#allocation2 + $0xf8] sm:$0xff]   ;;  %v1108_v48 = vld [vmem:[%s1751_s2 + $0x1] sm:$0x1]  ;;  %v1482_v59 = vld [vmem:[#allocation2 + $0x108] sm:$0xff]  }
  0x1e   :  { %1270 = vmatprep.subr.bf16.mxu0 %v1560_v0  ;;  %1290 = vmatprep.subr.bf16.mxu1 %v1560_v0  ;;  %v1480_v47 = vld [vmem:[#allocation2 + $0xb8] sm:$0xff]   ;;  %v164_v49 = vunpack.c.l.bf16 %v1108_v48  ;;  %v1481_v57 = vld [vmem:[#allocation2 + $0x100] sm:$0xff]   ;;  %v1483_v60 = vld [vmem:[#allocation2 + $0x110] sm:$0xff]  }
  0x1f   :  { %v1484_v61 = vld [vmem:[#allocation2 + $0x118] sm:$0xff]   ;;  %v1485_v62 = vld [vmem:[#allocation2 + $0x120] sm:$0xff]   ;;  %v1486_v1 = vld [vmem:[#allocation2 + $0x128] sm:$0xff]  }
  0x20   :  { %v168_v50 = vrot.slane %v164_v49, %v1635_v30  ;;  %v1127_v63 = vld [vmem:[%s1751_s2 + $0x3] sm:$0x1]  ;;  %v1487_v3 = vld [vmem:[#allocation2 + $0x130] sm:$0xff]   ;;  %v1488_v6 = vld [vmem:[#allocation2 + $0x138] sm:$0xff]   ;;  %v1700_v49 = vand.u32 127, %v30_v26 }
  0x21   :  { %1271 = vmatpush3.bf16.msra.mxu0 %v1452_v5  ;;  %1291 = vmatpush3.bf16.msra.mxu1 %v1460_v10  ;;  %v403_v2 = vunpack.c.l.bf16 %v1127_v63  ;;  %v1490_v14 = vld [vmem:[#allocation2 + $0x188] sm:$0xff]   ;;  %v1503_v28 = vld [vmem:[#allocation2 + $0x170] sm:$0xff]   ;;  %v1504_v29 = vld [vmem:[#allocation2 + $0x178] sm:$0xff]  }
  0x22   :  { %1272 = vmatprep.subr.bf16.mxu0 %v1560_v0  ;;  %1292 = vmatprep.subr.bf16.mxu1 %v1560_v0  ;;  %v1502_v27 = vld [vmem:[#allocation2 + $0x168] sm:$0xff]   ;;  %vm371_vm1 = vcmp.lt.s32.totalorder %v1700_v49, 16  ;;  %v1507_v26 = vld [vmem:[#allocation2 + $0x1d0] sm:$0xff]   ;;  %v1509_v63 = vld [vmem:[#allocation2 + $0x1e0] sm:$0xff]   ;;  %vm724_vm2 = vcmp.lt.s32.totalorder %v1700_v49, 4 }
  0x23   :  { %v407_v4 = vrot.slane %v403_v2, %v1635_v30  ;;  %v1510_v2 = vld [vmem:[#allocation2 + $0x1e8] sm:$0xff]  }
  0x25   :  { %1273 = vmatpush3.bf16.msra.mxu0 %v1453_v7  ;;  %1293 = vmatpush3.bf16.msra.mxu1 %v1461_v12  ;;  %v1489_v12 = vld [vmem:[#allocation2 + $0x180] sm:$0xff]  }
  0x26   :  { %1274 = vmatprep.subr.bf16.mxu0 %v1560_v0  ;;  %1294 = vmatprep.subr.bf16.mxu1 %v1560_v0 }
  0x29   :  { %1275 = vmatpush3.bf16.msra.mxu0 %v1454_v9  ;;  %1295 = vmatpush3.bf16.msra.mxu1 %v1462_v15  ;;  %v1491_v15 = vld [vmem:[#allocation2 + $0x190] sm:$0xff]  }
  0x2a   :  { %1276 = vmatprep.subr.bf16.mxu0 %v1560_v0  ;;  %1296 = vmatprep.subr.bf16.mxu1 %v1560_v0 }
  0x2d   :  { %1277 = vmatpush3.bf16.msra.mxu0 %v1455_v11  ;;  %1297 = vmatpush3.bf16.msra.mxu1 %v1463_v17  ;;  %v1492_v17 = vld [vmem:[#allocation2 + $0x198] sm:$0xff]  }
  0x2e   :  { %1278 = vmatprep.subr.bf16.mxu0 %v1560_v0  ;;  %1298 = vmatprep.subr.bf16.mxu1 %v1560_v0 }
  0x31   :  { %1279 = vmatpush3.bf16.msra.mxu0 %v1456_v13  ;;  %1299 = vmatpush3.bf16.msra.mxu1 %v1464_v18  ;;  %v1493_v18 = vld [vmem:[#allocation2 + $0x1a0] sm:$0xff]  }
  0x32   :  { %1304 = vmatprep.subr.bf16.mxu0 %v1560_v0  ;;  %1324 = vmatprep.subr.bf16.mxu1 %v1560_v0 }
  0x34   :  { %1281 = vmatmul.mubr.bf16.vlgmr.msra.gmra.mrb[0].mxu0 %v1615_v16 }
  0x35   :  { %1320 = vmatprep.mubr.msk.bf16.mxu0 %vm1561_vm0, %v1560_v0  ;;  %1305 = vmatpush3.bf16.msra.mxu0 %v1473_v19  ;;  %v1494_v19 = vld [vmem:[#allocation2 + $0x1a8] sm:$0xff]  }
  0x36   :  { %1306 = vmatprep.subr.bf16.mxu0 %v1560_v0 }
  0x39   :  { %1307 = vmatpush3.bf16.msra.mxu0 %v1474_v20  ;;  %v1495_v20 = vld [vmem:[#allocation2 + $0x1b0] sm:$0xff]  }
  0x3a   :  { %1308 = vmatprep.subr.bf16.mxu0 %v1560_v0 }
  0x3d   :  { %1309 = vmatpush3.bf16.msra.mxu0 %v1475_v21  ;;  %v1496_v21 = vld [vmem:[#allocation2 + $0x1b8] sm:$0xff]  }
  0x3e   :  { %1310 = vmatprep.subr.bf16.mxu0 %v1560_v0 }
  0x41   :  { %1311 = vmatpush3.bf16.msra.mxu0 %v1476_v22  ;;  %v1497_v22 = vld [vmem:[#allocation2 + $0x140] sm:$0xff]  }
  0x42   :  { %1312 = vmatprep.subr.bf16.mxu0 %v1560_v0 }
  0x45   :  { %1313 = vmatpush3.bf16.msra.mxu0 %v1477_v23  ;;  %v1498_v23 = vld [vmem:[#allocation2 + $0x148] sm:$0xff]  }
  0x46   :  { %1314 = vmatprep.subr.bf16.mxu0 %v1560_v0 }
  0x49   :  { %1315 = vmatpush3.bf16.msra.mxu0 %v1478_v24  ;;  %v1499_v24 = vld [vmem:[#allocation2 + $0x150] sm:$0xff]  }
  0x4a   :  { %1316 = vmatprep.subr.bf16.mxu0 %v1560_v0 }
  0x4d   :  { %1317 = vmatpush3.bf16.msra.mxu0 %v1479_v25  ;;  %v1500_v25 = vld [vmem:[#allocation2 + $0x158] sm:$0xff]  }
  0x4e   :  { %1318 = vmatprep.subr.bf16.mxu0 %v1560_v0 }
  0x51   :  { %1319 = vmatpush3.bf16.msra.mxu0 %v1480_v47 }
  0x52   :  { %1344 = vmatprep.subr.bf16.mxu0 %v1560_v0 }
 0x107   :  { %v137_v32 = vpop.f32.mrb[0].mxu0 }
 0x108   :  { %v138_v33 = vadd.f32 %v137_v32, %v54_v31  ;;  %v1282_v34 = vpop.f32.mrb[1].mxu0  ;;  %v1117_v31 = vld [vmem:[%s1751_s2 + $0x2] sm:$0x1] }
 0x109   :  { %v140_v35 = vpop.f32.mrb[2].mxu0  ;;  %v278_v32 = vunpack.c.l.bf16 %v1117_v31 }
 0x10a   :  { %v143_v36 = vmax.f32 %v138_v33, 0.0  ;;  %v1283_v37 = vpop.f32.mrb[3].mxu0 }
 0x10b   :  { %v282_v33 = vrot.slane %v278_v32, %v1635_v30 }
 0x10c   :  { %v144_v39 = vpack.c.bf16 %v143_v36, %v143_v36 }
 0x10e   :  { %1301 = vmatmul.mubr.bf16.vlgmr.msra.gmra.mrb[0].mxu1 %v144_v39 }
 0x10f   :  { %1325 = vmatpush3.bf16.msra.mxu1 %v1465_v38  ;;  %1340 = vmatprep.mubr.msk.bf16.mxu1 %vm1561_vm0, %v1560_v0 }
 0x110   :  { %1326 = vmatprep.subr.bf16.mxu1 %v1560_v0 }
 0x113   :  { %1327 = vmatpush3.bf16.msra.mxu1 %v1466_v40 }
 0x114   :  { %1328 = vmatprep.subr.bf16.mxu1 %v1560_v0 }
 0x117   :  { %1329 = vmatpush3.bf16.msra.mxu1 %v1467_v41 }
 0x118   :  { %1330 = vmatprep.subr.bf16.mxu1 %v1560_v0 }
 0x11b   :  { %1331 = vmatpush3.bf16.msra.mxu1 %v1468_v42 }
 0x11c   :  { %1332 = vmatprep.subr.bf16.mxu1 %v1560_v0 }
 0x11f   :  { %1333 = vmatpush3.bf16.msra.mxu1 %v1469_v43 }
 0x120   :  { %1334 = vmatprep.subr.bf16.mxu1 %v1560_v0 }
 0x123   :  { %1335 = vmatpush3.bf16.msra.mxu1 %v1470_v44  ;;  %v1136_v44 = vld [vmem:[%s1751_s2 + $0x4] sm:$0x1] }
 0x124   :  { %1336 = vmatprep.subr.bf16.mxu1 %v1560_v0 }
 0x127   :  { %1337 = vmatpush3.bf16.msra.mxu1 %v1471_v45  ;;  %v517_v45 = vunpack.c.l.bf16 %v1136_v44 }
 0x128   :  { %1338 = vmatprep.subr.bf16.mxu1 %v1560_v0 }
 0x12b   :  { %1339 = vmatpush3.bf16.msra.mxu1 %v1472_v46  ;;  %v521_v46 = vrot.slane %v517_v45, %v1635_v30 }
 0x12c   :  { %1364 = vmatprep.subr.bf16.mxu1 %v1560_v0 }
 0x12e   :  { %1341 = vmatmul.mubr.bf16.vlgmr.msra.gmra.mrb[4].mxu1 %v1615_v16 }
 0x12f   :  { %1380 = vmatprep.mubr.msk.bf16.mxu1 %vm1561_vm0, %v1560_v0  ;;  %1365 = vmatpush3.bf16.msra.mxu1 %v1497_v22  ;;  %v1520_v22 = vld [vmem:[#allocation2 + $0x238] sm:$0xff]  }
 0x130   :  { %1366 = vmatprep.subr.bf16.mxu1 %v1560_v0 }
 0x133   :  { %1367 = vmatpush3.bf16.msra.mxu1 %v1498_v23  ;;  %v1145_v23 = vld [vmem:[%s1751_s2 + $0x5] sm:$0x1] }
 0x134   :  { %1368 = vmatprep.subr.bf16.mxu1 %v1560_v0 }
 0x137   :  { %1369 = vmatpush3.bf16.msra.mxu1 %v1499_v24  ;;  %v631_v24 = vunpack.c.l.bf16 %v1145_v23 }
 0x138   :  { %1370 = vmatprep.subr.bf16.mxu1 %v1560_v0 }
 0x13b   :  { %1371 = vmatpush3.bf16.msra.mxu1 %v1500_v25  ;;  %v635_v25 = vrot.slane %v631_v24, %v1635_v30 }
 0x13c   :  { %1372 = vmatprep.subr.bf16.mxu1 %v1560_v0 }
 0x1e1   :  { %v251_v51 = vpop.f32.mrb[0].mxu1 }
 0x1e2   :  { %v252_v52 = vadd.f32 %v251_v51, %v168_v50  ;;  %v1302_v53 = vpop.f32.mrb[1].mxu1 }
 0x1e3   :  { %v254_v54 = vpop.f32.mrb[2].mxu1 }
 0x1e4   :  { %v257_v55 = vmax.f32 %v252_v52, 0.0  ;;  %v1303_v56 = vpop.f32.mrb[3].mxu1 }
 0x1e6   :  { %v258_v58 = vpack.c.bf16 %v257_v55, %v257_v55 }
 0x1e8   :  { %1321 = vmatmul.mubr.bf16.vlgmr.msra.gmra.mrb[4].mxu0 %v258_v58 }
 0x1e9   :  { %1345 = vmatpush3.bf16.msra.mxu0 %v1481_v57  ;;  %1360 = vmatprep.mubr.msk.bf16.mxu0 %vm1561_vm0, %v1560_v0  ;;  %v1505_v57 = vld [vmem:[#allocation2 + $0x1c0] sm:$0xff]  }
 0x1ea   :  { %1346 = vmatprep.subr.bf16.mxu0 %v1560_v0 }
 0x1ed   :  { %1347 = vmatpush3.bf16.msra.mxu0 %v1482_v59 }
 0x1ee   :  { %1348 = vmatprep.subr.bf16.mxu0 %v1560_v0 }
 0x1f1   :  { %1349 = vmatpush3.bf16.msra.mxu0 %v1483_v60 }
 0x1f2   :  { %1350 = vmatprep.subr.bf16.mxu0 %v1560_v0 }
 0x1f5   :  { %1351 = vmatpush3.bf16.msra.mxu0 %v1484_v61  ;;  %v1506_v61 = vld [vmem:[#allocation2 + $0x1c8] sm:$0xff]  }
 0x1f6   :  { %1352 = vmatprep.subr.bf16.mxu0 %v1560_v0 }
 0x1f9   :  { %1353 = vmatpush3.bf16.msra.mxu0 %v1485_v62  ;;  %v1508_v62 = vld [vmem:[#allocation2 + $0x1d8] sm:$0xff]  }
 0x1fa   :  { %1354 = vmatprep.subr.bf16.mxu0 %v1560_v0 }
 0x1fd   :  { %1355 = vmatpush3.bf16.msra.mxu0 %v1486_v1  ;;  %v1155_v1 = vld [vmem:[%s1751_s2 + $0x6] sm:$0x1] }
 0x1fe   :  { %1356 = vmatprep.subr.bf16.mxu0 %v1560_v0 }
 0x201   :  { %v490_v5 = vpop.f32.mrb[4].mxu1  ;;  %1357 = vmatpush3.bf16.msra.mxu0 %v1487_v3  ;;  %v759_v3 = vunpack.c.l.bf16 %v1155_v1 }
 0x202   :  { %v491_v7 = vadd.f32 %v490_v5, %v407_v4  ;;  %v1342_v8 = vpop.f32.mrb[5].mxu1  ;;  %1358 = vmatprep.subr.bf16.mxu0 %v1560_v0  ;;  %v1511_v4 = vld [vmem:[#allocation2 + $0x1f0] sm:$0xff]  }
 0x203   :  { %v493_v9 = vpop.f32.mrb[6].mxu1  ;;  %v763_v5 = vrot.slane %v759_v3, %v1635_v30 }
 0x204   :  { %v496_v10 = vmax.f32 %v491_v7, 0.0  ;;  %v1343_v11 = vpop.f32.mrb[7].mxu1  ;;  %v1512_v7 = vld [vmem:[#allocation2 + $0x1f8] sm:$0xff]  }
 0x205   :  { %1359 = vmatpush3.bf16.msra.mxu0 %v1488_v6 }
 0x206   :  { %v497_v13 = vpack.c.bf16 %v496_v10, %v496_v10  ;;  %1384 = vmatprep.subr.bf16.mxu0 %v1560_v0 }
 0x208   :  { %1361 = vmatmul.mubr.bf16.vlgmr.msra.gmra.mrb[8].mxu0 %v497_v13 }
 0x209   :  { %1385 = vmatpush3.bf16.msra.mxu0 %v1489_v12  ;;  %1400 = vmatprep.mubr.msk.bf16.mxu0 %vm1561_vm0, %v1560_v0 }
 0x20a   :  { %1386 = vmatprep.subr.bf16.mxu0 %v1560_v0 }
 0x20d   :  { %1387 = vmatpush3.bf16.msra.mxu0 %v1490_v14  ;;  %v1513_v14 = vld [vmem:[#allocation2 + $0x200] sm:$0xff]  }
 0x20e   :  { %1388 = vmatprep.subr.bf16.mxu0 %v1560_v0 }
 0x211   :  { %1389 = vmatpush3.bf16.msra.mxu0 %v1491_v15  ;;  %v1514_v15 = vld [vmem:[#allocation2 + $0x208] sm:$0xff]  }
 0x212   :  { %1390 = vmatprep.subr.bf16.mxu0 %v1560_v0 }
 0x215   :  { %1391 = vmatpush3.bf16.msra.mxu0 %v1492_v17  ;;  %v1515_v17 = vld [vmem:[#allocation2 + $0x210] sm:$0xff]  }
 0x216   :  { %1392 = vmatprep.subr.bf16.mxu0 %v1560_v0 }
 0x219   :  { %1393 = vmatpush3.bf16.msra.mxu0 %v1493_v18  ;;  %v1516_v18 = vld [vmem:[#allocation2 + $0x218] sm:$0xff]  }
 0x21a   :  { %1394 = vmatprep.subr.bf16.mxu0 %v1560_v0 }
 0x21d   :  { %1395 = vmatpush3.bf16.msra.mxu0 %v1494_v19  ;;  %v1517_v19 = vld [vmem:[#allocation2 + $0x220] sm:$0xff]  }
 0x21e   :  { %1396 = vmatprep.subr.bf16.mxu0 %v1560_v0 }
 0x221   :  { %1397 = vmatpush3.bf16.msra.mxu0 %v1495_v20  ;;  %v1518_v20 = vld [vmem:[#allocation2 + $0x228] sm:$0xff]  }
 0x222   :  { %1398 = vmatprep.subr.bf16.mxu0 %v1560_v0 }
 0x225   :  { %1399 = vmatpush3.bf16.msra.mxu0 %v1496_v21  ;;  %v1519_v21 = vld [vmem:[#allocation2 + $0x230] sm:$0xff]  }
 0x226   :  { %1424 = vmatprep.subr.bf16.mxu0 %v1560_v0 }
 0x228   :  { %1401 = vmatmul.mubr.bf16.vlgmr.msra.gmra.mrb[12].mxu0 %v1615_v16  ;;  %v1501_v16 = vld [vmem:[#allocation2 + $0x160] sm:$0xff]  }
 0x229   :  { %1440 = vmatprep.mubr.msk.bf16.mxu0 %vm1561_vm0, %v1560_v0  ;;  %1373 = vmatpush3.bf16.msra.mxu1 %v1501_v16 }
 0x22a   :  { %1374 = vmatprep.subr.bf16.mxu1 %v1560_v0  ;;  %1425 = vmatpush3.bf16.msra.mxu0 %v1513_v14 }
 0x22b   :  { %1426 = vmatprep.subr.bf16.mxu0 %v1560_v0 }
 0x22d   :  { %1375 = vmatpush3.bf16.msra.mxu1 %v1502_v27 }
 0x22e   :  { %1376 = vmatprep.subr.bf16.mxu1 %v1560_v0  ;;  %1427 = vmatpush3.bf16.msra.mxu0 %v1514_v15 }
 0x22f   :  { %1428 = vmatprep.subr.bf16.mxu0 %v1560_v0 }
 0x231   :  { %1377 = vmatpush3.bf16.msra.mxu1 %v1503_v28 }
 0x232   :  { %1378 = vmatprep.subr.bf16.mxu1 %v1560_v0  ;;  %1429 = vmatpush3.bf16.msra.mxu0 %v1515_v17 }
 0x233   :  { %1430 = vmatprep.subr.bf16.mxu0 %v1560_v0 }
 0x235   :  { %1379 = vmatpush3.bf16.msra.mxu1 %v1504_v29 }
 0x236   :  { %1404 = vmatprep.subr.bf16.mxu1 %v1560_v0  ;;  %1431 = vmatpush3.bf16.msra.mxu0 %v1516_v18 }
 0x237   :  { %1432 = vmatprep.subr.bf16.mxu0 %v1560_v0 }
 0x23a   :  { %1433 = vmatpush3.bf16.msra.mxu0 %v1517_v19 }
 0x23b   :  { %1434 = vmatprep.subr.bf16.mxu0 %v1560_v0 }
 0x23e   :  { %1435 = vmatpush3.bf16.msra.mxu0 %v1518_v20 }
 0x23f   :  { %1436 = vmatprep.subr.bf16.mxu0 %v1560_v0 }
 0x242   :  { %1437 = vmatpush3.bf16.msra.mxu0 %v1519_v21 }
 0x243   :  { %1438 = vmatprep.subr.bf16.mxu0 %v1560_v0 }
 0x246   :  { %1439 = vmatpush3.bf16.msra.mxu0 %v1520_v22 }
 0x2bb   :  { %v365_v34 = vpop.f32.mrb[4].mxu0 }
 0x2bc   :  { %v366_v35 = vadd.f32 %v365_v34, %v282_v33  ;;  %v1322_v36 = vpop.f32.mrb[5].mxu0 }
 0x2bd   :  { %v368_v37 = vpop.f32.mrb[6].mxu0 }
 0x2be   :  { %v1126_v38 = vclamps-f32 %v366_v35, 60.0  ;;  %v1323_v39 = vpop.f32.mrb[7].mxu0 }
 0x2c0   :  { %v374_v40 = vsub.f32 0.0, %v1126_v38 }
 0x2c2   :  { %v375_v41 = vmul.f32 1.442695, %v374_v40 }
 0x2c4   :  { %1521 = vpow2.f32 %v375_v41 }
 0x2ce   :  { %v1522_v42 = vpop.eup %1521 }
 0x2cf   :  { %v377_v43 = vadd.f32 1.0, %v1522_v42 }
 0x2d1   :  { %1523 = vrcp.f32 %v377_v43 }
 0x2db   :  { %v1524_v47 = vpop.eup %1523  ;;  %v604_v48 = vpop.f32.mrb[8].mxu0 }
 0x2dc   :  { %v379_v50 = vmul.f32 %v1524_v47, %v377_v43  ;;  %v605_v51 = vadd.f32 %v604_v48, %v521_v46  ;;  %v1362_v52 = vpop.f32.mrb[9].mxu0  ;;  %v1173_v46 = vld [vmem:[%s1751_s2 + $0x8] sm:$0x1] }
 0x2dd   :  { %v607_v53 = vpop.f32.mrb[10].mxu0 }
 0x2de   :  { %v380_v54 = vsub.f32 2.0, %v379_v50  ;;  %v610_v55 = vmax.f32 %v605_v51, 0.0  ;;  %v1363_v56 = vpop.f32.mrb[11].mxu0 }
 0x2e0   :  { %v611_v58 = vpack.c.bf16 %v610_v55, %v610_v55  ;;  %v381_v59 = vmul.f32 %v1524_v47, %v380_v54  ;;  %v987_v47 = vunpack.c.l.bf16 %v1173_v46 }
 0x2e2   :  { %1381 = vmatmul.mubr.bf16.vlgmr.msra.gmra.mrb[8].mxu1 %v611_v58  ;;  %v382_v60 = vsel %vm371_vm1, %v381_v59, 0.0  ;;  %v991_v48 = vrot.slane %v987_v47, %v1635_v30 }
 0x2e3   :  { %1405 = vmatpush3.bf16.msra.mxu1 %v1505_v57  ;;  %1420 = vmatprep.mubr.msk.bf16.mxu1 %vm1561_vm0, %v1560_v0  ;;  %383 = vst [vmem:[%s1752_s3] sm:$0xff] %v382_v60 }
 0x2e4   :  { %1406 = vmatprep.subr.bf16.mxu1 %v1560_v0 }
 0x2e7   :  { %1407 = vmatpush3.bf16.msra.mxu1 %v1506_v61 }
 0x2e8   :  { %1408 = vmatprep.subr.bf16.mxu1 %v1560_v0 }
 0x2eb   :  { %1409 = vmatpush3.bf16.msra.mxu1 %v1507_v26 }
 0x2ec   :  { %1410 = vmatprep.subr.bf16.mxu1 %v1560_v0 }
 0x2ef   :  { %1411 = vmatpush3.bf16.msra.mxu1 %v1508_v62 }
 0x2f0   :  { %1412 = vmatprep.subr.bf16.mxu1 %v1560_v0 }
 0x2f3   :  { %1413 = vmatpush3.bf16.msra.mxu1 %v1509_v63 }
 0x2f4   :  { %1414 = vmatprep.subr.bf16.mxu1 %v1560_v0 }
 0x2f7   :  { %1415 = vmatpush3.bf16.msra.mxu1 %v1510_v2 }
 0x2f8   :  { %1416 = vmatprep.subr.bf16.mxu1 %v1560_v0 }
 0x2fb   :  { %v846_v6 = vpop.f32.mrb[12].mxu0  ;;  %1417 = vmatpush3.bf16.msra.mxu1 %v1511_v4 }
 0x2fc   :  { %v847_v8 = vadd.f32 %v846_v6, %v763_v5  ;;  %v1402_v9 = vpop.f32.mrb[13].mxu0  ;;  %1418 = vmatprep.subr.bf16.mxu1 %v1560_v0  ;;  %v1164_v0 = vld [vmem:[%s1751_s2 + $0x7] sm:$0x1] }
 0x2fd   :  { %v849_v10 = vpop.f32.mrb[14].mxu0  ;;  %v873_v33 = vunpack.c.l.bf16 %v1164_v0 }
 0x2fe   :  { %v852_v11 = vmax.f32 %v847_v8, 0.0  ;;  %v1403_v12 = vpop.f32.mrb[15].mxu0 }
 0x2ff   :  { %1419 = vmatpush3.bf16.msra.mxu1 %v1512_v7  ;;  %v877_v34 = vrot.slane %v873_v33, %v1635_v30 }
 0x300   :  { %v853_v13 = vpack.c.bf16 %v852_v11, %v852_v11 }
 0x302   :  { %1421 = vmatmul.mubr.bf16.vlgmr.msra.gmra.mrb[12].mxu1 %v853_v13 }
 0x3b5   :  { %v718_v16 = vpop.f32.mrb[8].mxu1 }
 0x3b6   :  { %v719_v27 = vadd.f32 %v718_v16, %v635_v25  ;;  %v1382_v28 = vpop.f32.mrb[9].mxu1 }
 0x3b7   :  { %v721_v29 = vpop.f32.mrb[10].mxu1 }
 0x3b8   :  { %v1383_v31 = vpop.f32.mrb[11].mxu1  ;;  %v725_v32 = vsel %vm724_vm2, %v719_v27, -1e+30 }
 0x3b9   :  { %726 = vmax.xlane.f32.xlu0 %v725_v32 }
 0x3d5   :  { %v960_v35 = vpop.f32.mrb[12].mxu1 }
 0x3d6   :  { %v961_v36 = vadd.f32 %v960_v35, %v877_v34  ;;  %v1422_v37 = vpop.f32.mrb[13].mxu1 }
 0x3d7   :  { %v963_v38 = vpop.f32.mrb[14].mxu1 }
 0x3d8   :  { %v966_v39 = vmax.f32 %v961_v36, 0.0  ;;  %v1423_v40 = vpop.f32.mrb[15].mxu1 }
 0x3da   :  { %v967_v41 = vpack.c.bf16 %v966_v39, %v966_v39 }
 0x3dc   :  { %1441 = vmatmul.mubr.bf16.vlgmr.msra.gmra.mrb[16].mxu0 %v967_v41 }
 0x446   :  { %v727_v42 = vpop.xlane.xlu0 %726 }
 0x447   :  { %v728_v43 = vsub.f32 %v725_v32, %v727_v42 }
 0x449   :  { %v729_v44 = vmul.f32 1.442695, %v728_v43 }
 0x44b   :  { %1525 = vpow2.f32 %v729_v44 }
 0x455   :  { %v1526_v45 = vpop.eup %1525 }
 0x456   :  { %731 = vadd.xlane.f32.xlu1 %v1526_v45 }
 0x4af   :  { %v1074_v50 = vpop.f32.mrb[16].mxu0 }
 0x4b0   :  { %v1075_v51 = vadd.f32 %v1074_v50, %v991_v48  ;;  %v1442_v52 = vpop.f32.mrb[17].mxu0 }
 0x4b1   :  { %v1077_v53 = vpop.f32.mrb[18].mxu0 }
 0x4b2   :  { %v1443_v54 = vpop.f32.mrb[19].mxu0  ;;  %v1080_v55 = vsel %vm724_vm2, %v1075_v51, -1e+30 }
 0x4b3   :  { %1081 = vmax.xlane.f32.xlu0 %v1080_v55 }
 0x4e3   :  { %v732_v56 = vpop.xlane.xlu1 %731 }
 0x4e4   :  { %1527 = vrcp.f32 %v732_v56 }
 0x4ee   :  { %v1528_v57 = vpop.eup %1527 }
 0x4ef   :  { %v734_v58 = vmul.f32 %v1528_v57, %v732_v56 }
 0x4f1   :  { %v735_v59 = vsub.f32 2.0, %v734_v58 }
 0x4f3   :  { %v736_v60 = vmul.f32 %v1528_v57, %v735_v59 }
 0x4f5   :  { %v737_v61 = vmul.f32 %v1526_v45, %v736_v60 }
 0x4f7   :  { %1154 = vst [vmem:[%s1752_s3 + $0x8] sm:$0xff] %v737_v61 }
 0x540   :  { %v1082_v30 = vpop.xlane.xlu0 %1081 }
 0x541   :  { %v1083_v26 = vsub.f32 %v1080_v55, %v1082_v30 }
 0x543   :  { %v1084_v62 = vmul.f32 1.442695, %v1083_v26 }
 0x545   :  { %1529 = vpow2.f32 %v1084_v62 }
 0x54f   :  { %v1530_v63 = vpop.eup %1529 }
 0x550   :  { %1086 = vadd.xlane.f32.xlu1 %v1530_v63 }
 0x5dd   :  { %v1087_v49 = vpop.xlane.xlu1 %1086 }
 0x5de   :  { %1531 = vrcp.f32 %v1087_v49 }
 0x5e8   :  { %v1532_v1 = vpop.eup %1531 }
 0x5e9   :  { %v1089_v2 = vmul.f32 %v1532_v1, %v1087_v49 }
 0x5eb   :  { %v1090_v3 = vsub.f32 2.0, %v1089_v2 }
 0x5ed   :  { %v1091_v4 = vmul.f32 %v1532_v1, %v1090_v3 }
 0x5ef   :  { %v1092_v5 = vmul.f32 %v1530_v63, %v1091_v4 }
 0x5f1   :  { %1182 = vst [vmem:[%s1752_s3 + $0x10] sm:$0xff] %v1092_v5 }
 0x5f2   :  { %1099 = vsyncpa [#allocation3], 1 }

</bundles_post_ra>
